<compile_context>
chip_gen: v7x
topology: tpu7x:2x2x1
jax: 0.10.0
libtpu: 0.0.40
codegen_flags: <defaults>
</compile_context>

<pallas_src>
import math

import jax
import jax.numpy as jnp
from jax.experimental import pallas as pl
from jax.experimental.pallas import tpu as pltpu


def _round_up(v, m):
    return ((v + m - 1) // m) * m


def _concat_squash_kernel(x_ref, wl_ref, bl_ref, gate_ref, hbias_ref, o_ref):
    # x_ref    : (1, TM, Din_p)   row tile of the current batch
    # wl_ref   : (Din_p, Dout_p)  resident main-layer weight
    # bl_ref   : (1, Dout_p)      main-layer bias
    # gate_ref : (1, 1, Dout_p)   per-batch sigmoid gate (precomputed)
    # hbias_ref: (1, 1, Dout_p)   per-batch hyper bias   (precomputed)
    # o_ref    : (1, TM, Dout_p)
    x = x_ref[0]                                                   # (TM, Din_p)
    h = jnp.dot(x, wl_ref[...], preferred_element_type=jnp.float32)
    h = h + bl_ref[...]                                            # (TM, Dout_p)
    out = h * gate_ref[0] + hbias_ref[0]                           # VPU fma, bcast over TM
    o_ref[0] = out.astype(o_ref.dtype)


def concat_squash_linear(ctx, x, params, *, row_tile=512):
    """ctx: (B, 1, dim_ctx), x: (B, N, dim_in) -> (B, N, dim_out)."""
    wl, bl, wg, bg, wb = params
    B, N, dim_in = x.shape
    dim_out = wl.shape[1]

    # ---- hoisted hyper nets: tiny (B, dim_ctx) x (dim_ctx, dim_out) matmuls ----
    c = ctx[:, 0, :]                                               # (B, dim_ctx)
    gate = jax.nn.sigmoid(jnp.dot(c, wg) + bg)                     # (B, dim_out)
    hbias = jnp.dot(c, wb)                                         # (B, dim_out)

    # ---- lane/sublane-aligned tiling ----
    din_p = _round_up(dim_in, 128)
    dout_p = _round_up(dim_out, 128)
    TM = min(row_tile, _round_up(N, 8))                            # rows per tile
    n_pad = _round_up(N, TM)
    n_tiles = n_pad // TM

    xp = jnp.pad(x, ((0, 0), (0, n_pad - N), (0, din_p - dim_in)))
    wlp = jnp.pad(wl, ((0, din_p - dim_in), (0, dout_p - dim_out)))
    blp = jnp.pad(bl, ((0, 0), (0, dout_p - dim_out)))
    gatep = jnp.pad(gate, ((0, 0), (0, dout_p - dim_out)))[:, None, :]   # (B,1,Dout_p)
    hbiasp = jnp.pad(hbias, ((0, 0), (0, dout_p - dim_out)))[:, None, :]  # (B,1,Dout_p)

    itemsize = jnp.dtype(x.dtype).itemsize
    cost = pl.CostEstimate(
        flops=2 * B * n_pad * din_p * dout_p + 3 * B * n_pad * dout_p,
        transcendentals=0,  # sigmoid is hoisted out of the kernel
        bytes_accessed=(xp.size + wlp.size + B * n_pad * dout_p) * itemsize,
    )

    out = pl.pallas_call(
        _concat_squash_kernel,
        out_shape=jax.ShapeDtypeStruct((B, n_pad, dout_p), x.dtype),
        grid_spec=pltpu.PrefetchScalarGridSpec(
            num_scalar_prefetch=0,
            grid=(B, n_tiles),
            in_specs=[
                pl.BlockSpec((1, TM, din_p), lambda b, t: (b, t, 0)),    # x tile
                pl.BlockSpec((din_p, dout_p), lambda b, t: (0, 0)),      # Wl (resident)
                pl.BlockSpec((1, dout_p), lambda b, t: (0, 0)),          # bl (resident)
                pl.BlockSpec((1, 1, dout_p), lambda b, t: (b, 0, 0)),    # gate[b]
                pl.BlockSpec((1, 1, dout_p), lambda b, t: (b, 0, 0)),    # hbias[b]
            ],
            out_specs=pl.BlockSpec((1, TM, dout_p), lambda b, t: (b, t, 0)),
        ),
        compiler_params=pltpu.CompilerParams(
            dimension_semantics=("parallel", "parallel")),
        cost_estimate=cost,
    )(xp, wlp, blp, gatep, hbiasp)

    return out[:, :N, :dim_out]


def init_params(key, dim_in, dim_out, dim_ctx, dtype=jnp.float32):
    """Deterministic init mirroring torch.nn.Linear (uniform +-1/sqrt(fan_in)).

    Weights are stored transposed, i.e. (in_features, out_features).
    """
    k1, k2, k3, k4, k5 = jax.random.split(key, 5)
    bl_in = 1.0 / math.sqrt(dim_in)
    bc_in = 1.0 / math.sqrt(dim_ctx)
    wl = jax.random.uniform(k1, (dim_in, dim_out), dtype, -bl_in, bl_in)
    bl = jax.random.uniform(k2, (1, dim_out), dtype, -bl_in, bl_in)
    wg = jax.random.uniform(k3, (dim_ctx, dim_out), dtype, -bc_in, bc_in)
    bg = jax.random.uniform(k4, (1, dim_out), dtype, -bc_in, bc_in)
    wb = jax.random.uniform(k5, (dim_ctx, dim_out), dtype, -bc_in, bc_in)
    return wl, bl, wg, bg, wb


def reference(ctx, x, params):
    wl, bl, wg, bg, wb = params
    gate = jax.nn.sigmoid(jnp.einsum("bmc,co->bmo", ctx, wg) + bg)
    bias = jnp.einsum("bmc,co->bmo", ctx, wb)
    return (jnp.einsum("bnd,do->bno", x, wl) + bl) * gate + bias


if __name__ == "__main__":
    B, N, dim_in, dim_out, dim_ctx = 2, 8, 32, 32, 4

    key = jax.random.PRNGKey(0)
    kp, kx, kc = jax.random.split(key, 3)

    params = init_params(kp, dim_in, dim_out, dim_ctx)
    x = jax.random.normal(kx, (B, N, dim_in), jnp.float32)
    ctx = jax.random.normal(kc, (B, 1, dim_ctx), jnp.float32)

    out = concat_squash_linear(ctx, x, params)
    out = jax.block_until_ready(out)

    ref = reference(ctx, x, params)
    assert out.shape == (B, N, dim_out)
    assert jnp.allclose(out, ref, atol=1e-5, rtol=1e-5), "mismatch vs reference"

    print("KERNEL_OK")
</pallas_src>

<mosaic_0001>
module attributes {stable_mosaic.version = 11 : i64} {
  func.func @_concat_squash_kernel(%arg0: i32, %arg1: i32, %arg2: memref<1x8x128xf32, #tpu.memory_space<vmem>>, %arg3: memref<128x128xf32, #tpu.memory_space<vmem>>, %arg4: memref<1x128xf32, #tpu.memory_space<vmem>>, %arg5: memref<1x1x128xf32, #tpu.memory_space<vmem>>, %arg6: memref<1x1x128xf32, #tpu.memory_space<vmem>>, %arg7: memref<1x8x128xf32, #tpu.memory_space<vmem>>) attributes {dimension_semantics = [#tpu.dimension_semantics<parallel>, #tpu.dimension_semantics<parallel>], iteration_bounds = array<i64: 2, 1>, scalar_prefetch = 0 : i64, scratch_operands = 0 : i64, tpu.core_type = #tpu.core_type<tc>, window_params = [{transform_indices = @transform_0, window_bounds = array<i64: 1, 8, 128>}, {pipeline_mode = #tpu.pipeline_mode<synchronous>, transform_indices = @transform_1, window_bounds = array<i64: 128, 128>}, {pipeline_mode = #tpu.pipeline_mode<synchronous>, transform_indices = @transform_2, window_bounds = array<i64: 1, 128>}, {transform_indices = @transform_3, window_bounds = array<i64: 1, 1, 128>}, {transform_indices = @transform_4, window_bounds = array<i64: 1, 1, 128>}, {transform_indices = @transform_5, window_bounds = array<i64: 1, 8, 128>}]} {
    %c0 = arith.constant 0 : index
    %c0_0 = arith.constant 0 : index
    %c0_1 = arith.constant 0 : index
    %0 = vector.load %arg2[%c0, %c0_0, %c0_1] : memref<1x8x128xf32, #tpu.memory_space<vmem>>, vector<1x8x128xf32>
    %1 = vector.shape_cast %0 : vector<1x8x128xf32> to vector<8x128xf32>
    %c0_2 = arith.constant 0 : index
    %c0_3 = arith.constant 0 : index
    %2 = vector.load %arg3[%c0_2, %c0_3] : memref<128x128xf32, #tpu.memory_space<vmem>>, vector<128x128xf32>
    %cst = arith.constant dense<0.000000e+00> : vector<8x128xf32>
    %3 = tpu.matmul %1, %2, %cst {dimension_numbers = #tpu.dot_dimension_numbers<[1], [0], [0], [1], [0, 0, 1, 1], [], []>} : vector<8x128xf32>, vector<128x128xf32>, vector<8x128xf32> -> vector<8x128xf32>
    %c0_4 = arith.constant 0 : index
    %c0_5 = arith.constant 0 : index
    %4 = vector.load %arg4[%c0_4, %c0_5] : memref<1x128xf32, #tpu.memory_space<vmem>>, vector<1x128xf32>
    %5 = vector.broadcast %4 : vector<1x128xf32> to vector<8x128xf32>
    %6 = arith.addf %3, %5 : vector<8x128xf32>
    %c0_6 = arith.constant 0 : index
    %c0_7 = arith.constant 0 : index
    %c0_8 = arith.constant 0 : index
    %7 = vector.load %arg5[%c0_6, %c0_7, %c0_8] : memref<1x1x128xf32, #tpu.memory_space<vmem>>, vector<1x1x128xf32>
    %8 = vector.shape_cast %7 : vector<1x1x128xf32> to vector<1x128xf32>
    %9 = vector.broadcast %8 : vector<1x128xf32> to vector<8x128xf32>
    %10 = arith.mulf %6, %9 : vector<8x128xf32>
    %c0_9 = arith.constant 0 : index
    %c0_10 = arith.constant 0 : index
    %c0_11 = arith.constant 0 : index
    %11 = vector.load %arg6[%c0_9, %c0_10, %c0_11] : memref<1x1x128xf32, #tpu.memory_space<vmem>>, vector<1x1x128xf32>
    %12 = vector.shape_cast %11 : vector<1x1x128xf32> to vector<1x128xf32>
    %13 = vector.broadcast %12 : vector<1x128xf32> to vector<8x128xf32>
    %14 = arith.addf %10, %13 : vector<8x128xf32>
    %c0_12 = arith.constant 0 : index
    %c0_13 = arith.constant 0 : index
    %c0_14 = arith.constant 0 : index
    %15 = vector.load %arg7[%c0_12, %c0_13, %c0_14] : memref<1x8x128xf32, #tpu.memory_space<vmem>>, vector<1x8x128xf32>
    %16 = vector.shape_cast %15 : vector<1x8x128xf32> to vector<8x128xf32>
    %17 = vector.shape_cast %14 : vector<8x128xf32> to vector<1x8x128xf32>
    tpu.vector_store %arg7[%c0_12, %c0_13, %c0_14], %17 {strides = array<i32>} : memref<1x8x128xf32, #tpu.memory_space<vmem>>, vector<1x8x128xf32>,
    return
  }
  func.func @transform_0(%arg0: i32, %arg1: i32) -> (i32, i32, i32) {
    %c0_i32 = arith.constant 0 : i32
    %c0_i32_0 = arith.constant 0 : i32
    return %arg0, %arg1, %c0_i32 : i32, i32, i32
  }
  func.func @transform_1(%arg0: i32, %arg1: i32) -> (i32, i32) {
    %c0_i32 = arith.constant 0 : i32
    %c0_i32_0 = arith.constant 0 : i32
    %c0_i32_1 = arith.constant 0 : i32
    return %c0_i32, %c0_i32_0 : i32, i32
  }
  func.func @transform_2(%arg0: i32, %arg1: i32) -> (i32, i32) {
    %c0_i32 = arith.constant 0 : i32
    %c0_i32_0 = arith.constant 0 : i32
    %c0_i32_1 = arith.constant 0 : i32
    return %c0_i32, %c0_i32_0 : i32, i32
  }
  func.func @transform_3(%arg0: i32, %arg1: i32) -> (i32, i32, i32) {
    %c0_i32 = arith.constant 0 : i32
    %c0_i32_0 = arith.constant 0 : i32
    %c0_i32_1 = arith.constant 0 : i32
    return %arg0, %c0_i32, %c0_i32_0 : i32, i32, i32
  }
  func.func @transform_4(%arg0: i32, %arg1: i32) -> (i32, i32, i32) {
    %c0_i32 = arith.constant 0 : i32
    %c0_i32_0 = arith.constant 0 : i32
    %c0_i32_1 = arith.constant 0 : i32
    return %arg0, %c0_i32, %c0_i32_0 : i32, i32, i32
  }
  func.func @transform_5(%arg0: i32, %arg1: i32) -> (i32, i32, i32) {
    %c0_i32 = arith.constant 0 : i32
    %c0_i32_0 = arith.constant 0 : i32
    return %arg0, %arg1, %c0_i32 : i32, i32, i32
  }
}

</mosaic_0001>

<bundles_post_ra>
// kernel: tpu_custom_call.1
= control target key start
LH: loop header
LB: loop body
LE: loop exit
PB: predicated region body
PF: predicated region fallthrough
CT: control target
= control target key end

     0   :  { %10 = vsyncpa [#allocation3], 0  ;;  %s1122_s0 = inlined_call_operand.hbm [shape: f32[2,8,128], index: 0, kind: input, shape index: {}]   ;;  %s1123_s1 = inlined_call_operand.hbm [shape: f32[128,128], index: 1, kind: input, shape index: {}]   ;;  %s1124_s2 = inlined_call_operand.vmem [shape: f32[1,128], index: 2, kind: input, shape index: {}]   ;;  %s1125_s3 = inlined_call_operand.vmem [shape: f32[2,1,128], index: 3, kind: input, shape index: {}]   ;;  %s1126_s4 = inlined_call_operand.vmem [shape: f32[2,1,128], index: 4, kind: input, shape index: {}]   ;;  %s1127_s5 = inlined_call_operand.hbm [shape: f32[2,8,128], index: 5, kind: output, shape index: {}]  }
   0x1   :  { %12 = vsyncpa [#allocation3 + $0x1], 0 }
   0x2   :  { %13 = vsyncpa [#allocation6], 0 }
   0x3   :  { %14 = vsyncpa [#allocation4], 0 }
   0x4   :  { %16 = vsyncpa [#allocation4 + $0x1], 0  ;;  %s890_s18 = smov 0   ;;  %s892_s19 = smov 0  }
   0x5   :  { %s894_s20 = smov 0   ;;  %s896_s21 = smov 0  }
   0x6   :  { %s898_s22 = smov 0   ;;  %s900_s23 = smov 0  }
   0x7 LB: > { %s534_s24 = sadd.s32 4294967295, %s850_s23   ;;  %s535_s25 = sadd.s32 4294967294, %s850_s23   ;;  %s850_s23 = sphi %s900_s23, %s22_s23   ;;  %s846_s22 = sphi %s898_s22, %s1151_s22   ;;  %s842_s21 = sphi %s896_s21, %s1150_s21   ;;  %s838_s20 = sphi %s894_s20, %s1149_s20   ;;  %s834_s19 = sphi %s892_s19, %s1148_s19   ;;  %s830_s18 = sphi %s890_s18, %s1147_s18  }
   0x8   : > { %p56_p0 = scmp.ne.s32.totalorder %s834_s19, %s830_s18  ;;  %p924_p1 = scmp.eq.s32.totalorder %s534_s24, 0 }
   0x9   : > { %p928_p2 = scmp.eq.s32.totalorder %s534_s24, 1  ;;  %p182_p3 = scmp.eq.s32.totalorder %s535_s25, 1 }
   0xa   : > { %s1132_s26 = scalar_select %p924_p1, 1, 0 }
   0xb   : > { %s1133_s27 = scalar_select %p928_p2, 1, 0 }
   0xc   : > { %p934_p4 = por %p924_p1, %p56_p0  ;;  %p536_p5 = scmp.ge.s32.totalorder %s850_s23, 1 }
   0xd   : > { %p939_p6 = por %p182_p3, %p56_p0  ;;  %p189_p7 = scmp.lt.s32.totalorder %s850_s23, 3 }
   0xe   : > { %s1134_s28 = scalar_select %p934_p4, 1, 0 }
   0xf   : > { %s1135_s29 = scalar_select %p939_p6, 1, 0 }
  0x10   : > { %p944_p8 = pnand %p536_p5, %p189_p7  ;;  %s852_s6 = smov [#allocation5]  }
  0x11   : > { %s201_s7 = sshll.u32 %s852_s6, 4  ;;  %s34_s9 = sadd.s32 1, %s846_s22  ;;  %s202_s7 = int_to_ptr.vmem [resolvable:$true] %s201_s7 }
  0x12   : > { %s1136_s30 = scalar_select %p944_p8, 1, 0 }
  0x13   : > { %p636_p9 = pneg %p944_p8  ;;  %s706_s12 = scalar_lea.hbm %s1123_s1, 2048 }
  0x14   : > { %p707_p12 = scmp.ne.s32.totalorder %s1123_s1, %s706_s12  ;;  %p713_p5 = scmp.lt.u32.totalorder %s706_s12, %s1123_s1 }
  0x15   : > { %p953_p11 = pnand %p636_p9, %p924_p1 }
  0x17   : > { %p708_p13 = pneg %p953_p11 }
  0x19   : > { %p709_p0 = pnand %p708_p13, %p707_p12 }
  0x1b   : > { %p710_p3 = pneg %p709_p0 }
  0x1d   : > { %p715_p7 = pnand %p713_p5, %p710_p3 }
  0x1f   : > { %718 = shalt.err (!%p715_p7)
}
  0x20   : > { %s719_s17 = scalar_lea.vmem %s202_s7, 2048  ;;  %p727_p1 = scmp.lt.s32.totalorder %s202_s7, %s202_s7 }
  0x21   : > { %p720_p9 = scmp.ne.s32.totalorder %s202_s7, %s719_s17  ;;  %p728_p4 = scmp.lt.s32.totalorder %s719_s17, %s719_s17 }
  0x23   : > { %p722_p10 = pnand %p720_p9, %p708_p13  ;;  %p729_p8 = por %p728_p4, %p727_p1 }
  0x25   : > { %p723_p6 = pneg %p722_p10 }
  0x27   : > { %p730_p2 = pnand %p729_p8, %p723_p6 }
  0x29   : > { %733 = shalt.err (!%p730_p2)
}
  0x2a   : > { %s853_s24 = smov 128   ;;  %s854_s25 = smov 8  }
  0x2b   : > { %639 = dma.hbm_to_vmem [thread:$0]  (!%p953_p11), %s1123_s1, 2048, %s202_s7, [#allocation6], %s853_s24, %s853_s24, %s854_s25  }
  0x2c   : > { %p36_p1 = scmp.ge.s32.totalorder %s34_s9, 2  ;;  %s43_s11 = sadd.s32 1, %s838_s20 }
  0x2d   : > { %p50_p2 = scmp.ne.s32.totalorder %s838_s20, %s834_s19  ;;  %p51_p4 = scmp.eq.s32.totalorder %s850_s23, 0 }
  0x2e   : > { %s1153_s9 = smov (%p36_p1, %s34_s9), 0  ;;  %p1139_p8 = scmp.ne.s32.totalorder %s1133_s27, 0 }
  0x2f   : > { %p980_p6 = por %p51_p4, %p50_p2  ;;  %s38_s8 = ssub.s32 %s846_s22, %s1153_s9 }
  0x30   : > { %p986_p10 = por %p1139_p8, %p50_p2  ;;  %p649_p12 = scmp.lt.s32.totalorder %s850_s23, 2 }
  0x31   : > { %p41_p11 = scmp.eq.s32.totalorder %s38_s8, 0  ;;  %s218_s7 = sand.u32 1, %s838_s20  }
  0x32   : > { %s539_s14 = sshll.u32 %s218_s7, 3  ;;  %s540_s16 = sshll.u32 %s846_s22, 7 }
  0x33   : > { %s995_s15 = scalar_select %p41_p11, %s838_s20, %s43_s11  }
  0x34   : > { %s1001_s25 = scalar_lea.hbm %s1122_s0, %s540_s16  ;;  %s222_s27 = scalar_lea.vmem [#allocation2], %s539_s14 }
  0x35   : > { %s230_s6 = sshll.u32 %s222_s27, 4  ;;  %p1007_p13 = pnand %p649_p12, %p980_p6  ;;  %s1003_s6 = int_to_ptr.vmem [resolvable:$true] %s230_s6 }
  0x36   : > { %s219_s11 = scalar_lea.sflag [#allocation3], %s218_s7  ;;  %s734_s8 = scalar_lea.hbm %s1001_s25, 128 }
  0x37   : > { %p735_p0 = scmp.ne.s32.totalorder %s1001_s25, %s734_s8  ;;  %p736_p3 = pneg %p1007_p13 }
  0x38   : > { %s739_s17 = scalar_lea.hbm %s1122_s0, 256  ;;  %p740_p9 = scmp.lt.u32.totalorder %s1001_s25, %s1122_s0 }
  0x39   : > { %p737_p5 = pnand %p736_p3, %p735_p0  ;;  %p741_p1 = scmp.lt.u32.totalorder %s739_s17, %s734_s8 }
  0x3a   : > { %p743_p4 = scmp.lt.u32.totalorder %s734_s8, %s1001_s25 }
  0x3b   : > { %p738_p7 = pneg %p737_p5  ;;  %p742_p2 = por %p741_p1, %p740_p9 }
  0x3d   : > { %p744_p6 = por %p743_p4, %p742_p2 }
  0x3f   : > { %p745_p8 = pnand %p744_p6, %p738_p7 }
  0x41   : > { %748 = shalt.err (!%p745_p8)
}
  0x42   : > { %s749_s7 = scalar_lea.vmem %s1003_s6, 128  ;;  %s855_s27 = smov [#allocation2]  }
  0x43   : > { %p750_p12 = scmp.ne.s32.totalorder %s1003_s6, %s749_s7  ;;  %s754_s14 = sshll.u32 %s855_s27, 4  ;;  %s755_s14 = int_to_ptr.vmem [resolvable:$false] %s754_s14 }
  0x44   : > { %s756_s16 = scalar_lea.vmem %s755_s14, 256  ;;  %p757_p5 = scmp.lt.s32.totalorder %s1003_s6, %s755_s14 }
  0x45   : > { %p752_p11 = pnand %p750_p12, %p736_p3  ;;  %p758_p9 = scmp.lt.s32.totalorder %s756_s16, %s749_s7 }
  0x47   : > { %p753_p0 = pneg %p752_p11  ;;  %p759_p1 = por %p758_p9, %p757_p5 }
  0x49   : > { %p760_p2 = pnand %p759_p1, %p753_p0 }
  0x4b   : > { %763 = shalt.err (!%p760_p2)
}
  0x4c   : > { %643 = dma.hbm_to_vmem [thread:$0]  (!%p1007_p13), %s1001_s25, 128, %s1003_s6, %s219_s11  }
  0x4d   : > { %p1142_p7 = scmp.ne.s32.totalorder %s1136_s30, 0 }
  0x4e   : > { %s1039_s8 = sand.u32 (!%p1142_p7), 1, %s834_s19   ;;  %p1143_p3 = scmp.ne.s32.totalorder (!%p1142_p7), %s1134_s28, 0 }
  0x4f   : > { %251 = sbr.rel (%p1142_p7) target bundleno = 357 (0x165), region = 40  ;;  %s542_s17 = sshll.u32 (!%p1142_p7), %s1039_s8, 3 }
  0x50   : > { %s254_s12 = scalar_lea.sflag (!%p1142_p7), [#allocation3], %s1039_s8  ;;  %s1045_s24 = scalar_lea.vmem (!%p1142_p7), [#allocation2], %s542_s17 }
  0x56   : > { %817 = dma.done.wait (%p1143_p3), %s254_s12, 128  }
  0x57   : > { %819 = vsyncadd (%p1143_p3), %s254_s12, 4294967168  ;;  %p1144_p13 = scmp.ne.s32.totalorder %s1132_s26, 0 }
  0x59   : > { %821 = dma.done.wait (%p1144_p13), [#allocation6], 2048  }
  0x5a   : > { %823 = vsyncadd (%p1144_p13), [#allocation6], 4294965248  ;;  %v856_v0 = vmov 0.0|0.0   ;;  %vm857_vm0 = vmmov 0   ;;  %v858_v1 = vmov 0.0   ;;  %v301_v2 = vld [vmem:[#allocation5] sm:$0xff] }
  0x5b   : > { %604 = vmatprep.subr.bf16.mxu0 %v856_v0  ;;  %601 = vmatprep.mubr.msk.f32.mxu0 %vm857_vm0, %v858_v1  ;;  %v302_v3 = vld [vmem:[#allocation5 + $0x8] sm:$0xff]  ;;  %v303_v4 = vld [vmem:[#allocation5 + $0x10] sm:$0xff]  ;;  %v304_v6 = vld [vmem:[#allocation5 + $0x18] sm:$0xff]  ;;  %p294_p4 = scmp.lt.s32.totalorder %s842_s21, 1  ;;  %s549_s14 = sshll.u32 %s842_s21, 7 }
  0x5c   : > { %v605_v5 = vpack.c.bf16 %v302_v3, %v301_v2  ;;  %v608_v7 = vpack.c.bf16 %v304_v6, %v303_v4  ;;  %v305_v8 = vld [vmem:[#allocation5 + $0x20] sm:$0xff]  ;;  %v306_v9 = vld [vmem:[#allocation5 + $0x28] sm:$0xff]  ;;  %v307_v11 = vld [vmem:[#allocation5 + $0x30] sm:$0xff]  ;;  %s293_s16 = scalar_lea.vmem [#allocation7], %s542_s17  ;;  %s1073_s30 = scalar_lea.hbm %s1127_s5, %s549_s14 }
  0x5d   : > { %v611_v10 = vpack.c.bf16 %v306_v9, %v305_v8  ;;  %v308_v12 = vld [vmem:[#allocation5 + $0x38] sm:$0xff]  ;;  %v309_v14 = vld [vmem:[#allocation5 + $0x40] sm:$0xff]  ;;  %v310_v15 = vld [vmem:[#allocation5 + $0x48] sm:$0xff]  ;;  %s295_s26 = scalar_select %p294_p4, %s842_s21, 1 }
  0x5e   : > { %606 = vmatpush3.bf16.msra.mxu0 %v605_v5  ;;  %v614_v13 = vpack.c.bf16 %v308_v12, %v307_v11  ;;  %v617_v16 = vpack.c.bf16 %v310_v15, %v309_v14  ;;  %v311_v17 = vld [vmem:[#allocation5 + $0x50] sm:$0xff]  ;;  %v312_v18 = vld [vmem:[#allocation5 + $0x58] sm:$0xff]  ;;  %v313_v20 = vld [vmem:[#allocation5 + $0x60] sm:$0xff]  ;;  %s426_s12 = sshll.u32 %s293_s16, 4  ;;  %s859_s21 = smov [#allocation7]   ;;  %s1075_s12 = int_to_ptr.vmem [resolvable:$true] %s426_s12 }
  0x5f   : > { %607 = vmatprep.subr.bf16.mxu0 %v856_v0  ;;  %v620_v19 = vpack.c.bf16 %v312_v18, %v311_v17  ;;  %v314_v21 = vld [vmem:[#allocation5 + $0x68] sm:$0xff]  ;;  %v315_v23 = vld [vmem:[#allocation5 + $0x70] sm:$0xff]  ;;  %v316_v24 = vld [vmem:[#allocation5 + $0x78] sm:$0xff]  ;;  %s296_s25 = scalar_lea.vmem %s1125_s3, %s295_s26  ;;  %s299_s27 = scalar_lea.vmem %s1126_s4, %s295_s26 }
  0x60   : > { %v623_v22 = vpack.c.bf16 %v314_v21, %v313_v20  ;;  %v626_v25 = vpack.c.bf16 %v316_v24, %v315_v23  ;;  %v300_v26 = vld [vmem:[%s1045_s24] sm:$0xff]  ;;  %s412_s26 = scalar_lea.sflag [#allocation4], %s1039_s8  ;;  %s768_s17 = sshll.u32 %s859_s21, 4  ;;  %s769_s17 = int_to_ptr.vmem [resolvable:$false] %s768_s17 }
  0x61   : > { %v545_v27 = vld [vmem:[%s1124_s2] ss:$0 sm:$0xff]  ;;  %s770_s6 = scalar_lea.vmem %s769_s17, 256  ;;  %p771_p11 = scmp.lt.s32.totalorder %s1075_s12, %s769_s17 }
  0x62   : > { %609 = vmatpush3.bf16.msra.mxu0 %v608_v7  ;;  %v546_v29 = vld [vmem:[%s296_s25] ss:$0 sm:$0xff]  ;;  %s764_s25 = scalar_lea.vmem %s1075_s12, 128 }
  0x63   : > { %610 = vmatprep.subr.bf16.mxu0 %v856_v0  ;;  %v547_v32 = vld [vmem:[%s299_s27] ss:$0 sm:$0xff]  ;;  %p765_p6 = scmp.ne.s32.totalorder %s1075_s12, %s764_s25  ;;  %p772_p0 = scmp.lt.s32.totalorder %s770_s6, %s764_s25 }
  0x65   : > { %p766_p8 = pnand %p765_p6, %p986_p10  ;;  %p773_p5 = por %p772_p0, %p771_p11 }
  0x66   : > { %612 = vmatpush3.bf16.msra.mxu0 %v611_v10 }
  0x67   : > { %613 = vmatprep.subr.bf16.mxu0 %v856_v0  ;;  %p767_p12 = pneg %p766_p8 }
  0x69   : > { %p774_p9 = pnand %p773_p5, %p767_p12 }
  0x6a   : > { %615 = vmatpush3.bf16.msra.mxu0 %v614_v13 }
  0x6b   : > { %616 = vmatprep.subr.bf16.mxu0 %v856_v0 }
  0x6e   : > { %618 = vmatpush3.bf16.msra.mxu0 %v617_v16 }
  0x6f   : > { %619 = vmatprep.subr.bf16.mxu0 %v856_v0 }
  0x72   : > { %621 = vmatpush3.bf16.msra.mxu0 %v620_v19 }
  0x73   : > { %622 = vmatprep.subr.bf16.mxu0 %v856_v0 }
  0x76   : > { %624 = vmatpush3.bf16.msra.mxu0 %v623_v22 }
  0x77   : > { %625 = vmatprep.subr.bf16.mxu0 %v856_v0 }
  0x7a   : > { %627 = vmatpush3.bf16.msra.mxu0 %v626_v25 }
  0x7d   : > { %602 = vmatmul.mubr.f32.vlgmr.msra.gmra.mrb[0].mxu0 %v300_v26 }
 0x150   : > { %v390_v28 = vpop.f32.mrb[0].mxu0 }
 0x151   : > { %v391_v30 = vadd.f32 %v545_v27, %v390_v28  ;;  %v603_v31 = vpop.f32.mrb[1].mxu0 }
 0x153   : > { %v401_v33 = vmul.f32 %v546_v29, %v391_v30 }
 0x155   : > { %v409_v34 = vadd.f32 %v547_v32, %v401_v33 }
 0x157   : > { %410 = vst [vmem:[%s293_s16] sm:$0xff] %v409_v34 }
 0x158   : > { %777 = shalt.err (!%p774_p9)
}
 0x159   : > { %s778_s8 = scalar_lea.hbm %s1073_s30, 128  ;;  %s782_s7 = scalar_lea.hbm %s1127_s5, 256 }
 0x15a   : > { %p779_p1 = scmp.ne.s32.totalorder %s1073_s30, %s778_s8  ;;  %p783_p3 = scmp.lt.u32.totalorder %s1073_s30, %s1127_s5 }
 0x15b   : > { %p784_p13 = scmp.lt.u32.totalorder %s782_s7, %s778_s8  ;;  %p786_p6 = scmp.lt.u32.totalorder %s778_s8, %s1073_s30 }
 0x15c   : > { %p780_p2 = pnand %p779_p1, %p986_p10 }
 0x15d   : > { %p785_p4 = por %p784_p13, %p783_p3 }
 0x15e   : > { %p781_p7 = pneg %p780_p2 }
 0x15f   : > { %p787_p8 = por %p786_p6, %p785_p4 }
 0x161   : > { %p788_p12 = pnand %p787_p8, %p781_p7 }
 0x163   : > { %791 = shalt.err (!%p788_p12)
}
 0x164   : > { %634 = dma.vmem_to_hbm [thread:$0]  (%p986_p10), %s1075_s12, 128, %s1073_s30, %s412_s26  }
 0x165 PF: > { %s438_s16 = sand.u32 1, %s830_s18   ;;  %p1145_p11 = scmp.ne.s32.totalorder %s1135_s29, 0 }
 0x166   : > { %p1146_p0 = scmp.ge.s32.totalorder %s850_s23, 2  ;;  %s439_s24 = scalar_lea.sflag [#allocation4], %s438_s16 }
 0x168   : > { %p645_p5 = pnand %p1146_p0, %p1145_p11 }
 0x16a   : > { %825 = dma.done.wait (!%p645_p5), %s439_s24, 128  }
 0x16b   : > { %827 = vsyncadd (!%p645_p5), %s439_s24, 4294967168  ;;  %s22_s23 = sadd.s32 1, %s850_s23   ;;  %s1147_s18 = smov %s834_s19 }
 0x16c   : > { %p19_p9 = scmp.ge.s32.totalorder %s22_s23, 4   ;;  %s1148_s19 = smov %s838_s20 }
 0x16d   : > { %s1149_s20 = smov %s995_s15  ;;  %s1150_s21 = smov %s846_s22 }
 0x16e   : > { %s1151_s22 = smov %s1153_s9  ;;  %21 = sbr.rel (!%p19_p9) target bundleno = 7 (0x7), region = 95 }
 0x175   :  { %444 = vsyncpa [#allocation3], 1 }
 0x176   :  { %446 = vsyncpa [#allocation3 + $0x1], 1 }
 0x177   :  { %447 = vsyncpa [#allocation6], 1 }
 0x178   :  { %448 = vsyncpa [#allocation4], 1 }
 0x179   :  { %450 = vsyncpa [#allocation4 + $0x1], 1 }

</bundles_post_ra>
